<compile_context>
chip_gen: v7x
topology: tpu7x:2x2x1
jax: 0.10.0
libtpu: 0.0.40
codegen_flags: <defaults>
</compile_context>

<pallas_src>
import math

import jax
import jax.numpy as jnp
from jax.experimental import pallas as pl
from jax.experimental.pallas import tpu as pltpu

EPSILON = 1e-5
STRIDES = 256

_INV_STRIDES = 1.0 / STRIDES
_HALF_EPS = 0.5 * EPSILON
_INV_ONE_MINUS_EPS = 1.0 / (1.0 - EPSILON)


def _dequant_fwd_kernel(x_ref, u_ref, z_ref, rowsum_ref):
    """Data space -> latent space: dequantize with uniform noise, then logit."""
    j = pl.program_id(1)

    x = x_ref[...].astype(jnp.float32)
    u = u_ref[...]

    # Dequantize and epsilon-rescale into (0, 1).
    p = (x + u) * jnp.float32(_INV_STRIDES)
    p = p * jnp.float32(1.0 - EPSILON) + jnp.float32(_HALF_EPS)

    logp = jnp.log(p)
    log1mp = jnp.log(1.0 - p)
    z_ref[...] = logp - log1mp

    # Per-row partial sum of the logit Jacobian, accumulated over the D axis.
    partial = jnp.sum(-(logp + log1mp), axis=1, keepdims=True)

    @pl.when(j == 0)
    def _():
        rowsum_ref[...] = jnp.zeros_like(rowsum_ref)

    rowsum_ref[...] += partial


def _quant_rev_kernel(x_ref, z_ref, rowsum_ref):
    """Latent space -> data space: sigmoid, then quantize."""
    j = pl.program_id(1)

    x = x_ref[...].astype(jnp.float32)

    # sigmoid via exp (guaranteed Mosaic lowering); reuse it for the Jacobian:
    #   -x - 2*softplus(-x) == 2*log(sigmoid(x)) - x == -2*log(1 + e^{-x}) - x
    # Safe here: latents are bounded to |x| <= ~12.3 by the logit/eps construction.
    e = jnp.exp(-x)
    one_plus_e = 1.0 + e
    s_raw = 1.0 / one_plus_e
    partial = jnp.sum(-2.0 * jnp.log(one_plus_e) - x, axis=1, keepdims=True)

    s = (s_raw - jnp.float32(_HALF_EPS)) * jnp.float32(_INV_ONE_MINUS_EPS)
    zq = jnp.clip(jnp.floor(s * jnp.float32(STRIDES)), 0.0, jnp.float32(STRIDES - 1))
    z_ref[...] = zq.astype(jnp.int32)

    @pl.when(j == 0)
    def _():
        rowsum_ref[...] = jnp.zeros_like(rowsum_ref)

    rowsum_ref[...] += partial


def _row_pack_factor(batch, d):
    """Pack small batches into more rows so f32 vregs use all 8 sublanes."""
    r = 1
    while batch * r < 8 and d % (2 * r) == 0 and (d // (2 * r)) % 128 == 0:
        r *= 2
    return r


def _pick_tile(n, align, max_tile):
    """Largest multiple of `align` that divides n, capped at max_tile; else full n."""
    if n % align != 0:
        return n
    t = min(n, max_tile)
    t -= t % align
    while t >= align:
        if n % t == 0:
            return t
        t -= align
    return n


def dequantization_forward(x, log_det_jacobian, *, reverse=False, noise=None, rng_key=None):
    """Pallas implementation of Dequantization.forward.

    Args:
      x: [B, C, H, W] input (data space if reverse=False, latent if reverse=True).
      log_det_jacobian: [B] running log-determinant.
      reverse: direction flag matching the PyTorch module.
      noise: optional [B, C, H, W] uniform [0,1) noise (forward path only).
      rng_key: PRNG key used to draw the noise when `noise` is None.
    """
    B = x.shape[0]
    D = 1
    for s in x.shape[1:]:
        D *= int(s)

    r = _row_pack_factor(B, D)
    R, Dc = B * r, D // r
    tb = _pick_tile(R, 8, 256)
    td = _pick_tile(Dc, 128, 1024)
    grid = (R // tb, Dc // td)

    x2 = x.reshape(R, Dc).astype(jnp.float32)
    ldj_in = log_det_jacobian.reshape(B).astype(jnp.float32)

    tile_spec = pl.BlockSpec((tb, td), lambda i, j: (i, j))
    row_spec = pl.BlockSpec((tb, 1), lambda i, j: (i, 0))
    cparams = pltpu.CompilerParams(dimension_semantics=("parallel", "arbitrary"))

    if not reverse:
        if noise is None:
            if rng_key is None:
                rng_key = jax.random.PRNGKey(0)
            noise = jax.random.uniform(rng_key, x.shape, dtype=jnp.float32)
        # TODO(synk): on TPU-only deployments, generate the U[0,1) noise in-kernel
        # with pltpu.prng_random_bits (per-tile seeds) to cut HBM read traffic;
        # host-side noise is used here so the kernel also lowers on CPU/interpret.
        u2 = noise.reshape(R, Dc).astype(jnp.float32)

        z2, rowsum = pl.pallas_call(
            _dequant_fwd_kernel,
            grid=grid,
            in_specs=[tile_spec, tile_spec],
            out_specs=(tile_spec, row_spec),
            out_shape=(
                jax.ShapeDtypeStruct((R, Dc), jnp.float32),
                jax.ShapeDtypeStruct((R, 1), jnp.float32),
            ),
            compiler_params=cparams,
        )(x2, u2)

        const = (-math.log(STRIDES) + math.log(1.0 - EPSILON)) * D
    else:
        z2, rowsum = pl.pallas_call(
            _quant_rev_kernel,
            grid=grid,
            in_specs=[tile_spec],
            out_specs=(tile_spec, row_spec),
            out_shape=(
                jax.ShapeDtypeStruct((R, Dc), jnp.int32),
                jax.ShapeDtypeStruct((R, 1), jnp.float32),
            ),
            compiler_params=cparams,
        )(x2)

        const = (math.log(STRIDES) - math.log(1.0 - EPSILON)) * D

    ldj_out = ldj_in + rowsum.reshape(B, r).sum(axis=1) + jnp.float32(const)
    z = z2.reshape(x.shape)
    return z, ldj_out


# ----------------------------- pure-JAX references -----------------------------

def _reference_forward(x, ldj, noise):
    reduce_axes = tuple(range(1, x.ndim))
    D = 1
    for s in x.shape[1:]:
        D *= int(s)
    xf = x.astype(jnp.float32)
    p = (xf + noise) / STRIDES
    p = p * (1.0 - EPSILON) + 0.5 * EPSILON
    logp = jnp.log(p)
    log1mp = jnp.log(1.0 - p)
    z = logp - log1mp
    ldj = (
        ldj
        - math.log(STRIDES) * D
        + math.log(1.0 - EPSILON) * D
        + jnp.sum(-(logp + log1mp), axis=reduce_axes)
    )
    return z, ldj


def _reference_reverse(x, ldj):
    reduce_axes = tuple(range(1, x.ndim))
    D = 1
    for s in x.shape[1:]:
        D *= int(s)
    xf = x.astype(jnp.float32)
    s = jax.nn.sigmoid(xf)
    ldj = ldj + jnp.sum(-xf - 2.0 * jax.nn.softplus(-xf), axis=reduce_axes)
    s = (s - 0.5 * EPSILON) / (1.0 - EPSILON)
    ldj = ldj - math.log(1.0 - EPSILON) * D + math.log(STRIDES) * D
    z = jnp.clip(jnp.floor(s * STRIDES), 0, STRIDES - 1).astype(jnp.int32)
    return z, ldj


if __name__ == "__main__":
    key = jax.random.PRNGKey(0)
    kx, kn = jax.random.split(key)
    B, C, H, W = 2, 4, 16, 16

    # Data-space input: integer pixel levels in [0, strides), like a quantized image.
    x = jax.random.randint(kx, (B, C, H, W), 0, STRIDES).astype(jnp.float32)
    noise = jax.random.uniform(kn, (B, C, H, W), dtype=jnp.float32)
    ldj0 = jnp.zeros((B,), jnp.float32)

    # Data -> latent (default forward path).
    z, ldj_fwd = dequantization_forward(x, ldj0, reverse=False, noise=noise)
    jax.block_until_ready((z, ldj_fwd))
    assert z.shape == x.shape and ldj_fwd.shape == (B,)
    assert not bool(jnp.isnan(z).any()), "latent tensor contains NaN"
    assert not bool(jnp.isnan(ldj_fwd).any()), "forward log-det contains NaN"

    z_ref, ldj_fwd_ref = _reference_forward(x, ldj0, noise)
    assert bool(jnp.allclose(z, z_ref, rtol=1e-3, atol=1e-3)), "forward z mismatch vs reference"
    assert bool(jnp.allclose(ldj_fwd, ldj_fwd_ref, rtol=1e-3, atol=1.0)), "forward ldj mismatch vs reference"

    # Latent -> data (reverse branch of forward()).
    x_rec, ldj_rev = dequantization_forward(z, ldj_fwd, reverse=True)
    jax.block_until_ready((x_rec, ldj_rev))
    assert x_rec.dtype == jnp.int32
    assert not bool(jnp.isnan(ldj_rev).any()), "reverse log-det contains NaN"

    _, ldj_rev_ref = _reference_reverse(z, ldj_fwd)
    assert bool(jnp.allclose(ldj_rev, ldj_rev_ref, rtol=1e-3, atol=1.0)), "reverse ldj mismatch vs reference"

    # Round trip should recover the integer pixel levels (allow rare off-by-one
    # at floor boundaries from f32 transcendental round-off).
    x_int = x.astype(jnp.int32)
    assert int(jnp.max(jnp.abs(x_rec - x_int))) <= 1, "round-trip error larger than one level"
    assert float(jnp.mean((x_rec == x_int).astype(jnp.float32))) > 0.99, "round-trip mismatch rate too high"

    print("KERNEL_OK")
</pallas_src>

<mosaic_0001>
module attributes {stable_mosaic.version = 11 : i64} {
  func.func @_dequant_fwd_kernel(%arg0: i32, %arg1: i32, %arg2: memref<8x256xf32, #tpu.memory_space<vmem>>, %arg3: memref<8x256xf32, #tpu.memory_space<vmem>>, %arg4: memref<8x256xf32, #tpu.memory_space<vmem>>, %arg5: memref<8x1xf32, #tpu.memory_space<vmem>>) attributes {dimension_semantics = [#tpu.dimension_semantics<parallel>, #tpu.dimension_semantics<arbitrary>], iteration_bounds = array<i64: 1, 1>, scalar_prefetch = 0 : i64, scratch_operands = 0 : i64, tpu.core_type = #tpu.core_type<tc>, window_params = [{transform_indices = @transform_0, window_bounds = array<i64: 8, 256>}, {transform_indices = @transform_1, window_bounds = array<i64: 8, 256>}, {transform_indices = @transform_2, window_bounds = array<i64: 8, 256>}, {transform_indices = @transform_3, window_bounds = array<i64: 8, 1>}]} {
    %c0 = arith.constant 0 : index
    %c0_0 = arith.constant 0 : index
    %0 = vector.load %arg2[%c0, %c0_0] : memref<8x256xf32, #tpu.memory_space<vmem>>, vector<8x256xf32>
    %c0_1 = arith.constant 0 : index
    %c0_2 = arith.constant 0 : index
    %1 = vector.load %arg3[%c0_1, %c0_2] : memref<8x256xf32, #tpu.memory_space<vmem>>, vector<8x256xf32>
    %2 = arith.addf %0, %1 : vector<8x256xf32>
    %cst = arith.constant 3.906250e-03 : f32
    %3 = vector.broadcast %cst : f32 to vector<8x256xf32>
    %4 = arith.mulf %2, %3 : vector<8x256xf32>
    %cst_3 = arith.constant 0.999989986 : f32
    %5 = vector.broadcast %cst_3 : f32 to vector<8x256xf32>
    %6 = arith.mulf %4, %5 : vector<8x256xf32>
    %cst_4 = arith.constant 5.000000e-06 : f32
    %7 = vector.broadcast %cst_4 : f32 to vector<8x256xf32>
    %8 = arith.addf %6, %7 : vector<8x256xf32>
    %9 = math.log %8 : vector<8x256xf32>
    %cst_5 = arith.constant 1.000000e+00 : f32
    %10 = vector.broadcast %cst_5 : f32 to vector<8x256xf32>
    %11 = arith.subf %10, %8 : vector<8x256xf32>
    %12 = math.log %11 : vector<8x256xf32>
    %13 = arith.subf %9, %12 : vector<8x256xf32>
    %c0_6 = arith.constant 0 : index
    %c0_7 = arith.constant 0 : index
    %14 = vector.load %arg4[%c0_6, %c0_7] : memref<8x256xf32, #tpu.memory_space<vmem>>, vector<8x256xf32>
    tpu.vector_store %arg4[%c0_6, %c0_7], %13 {strides = array<i32>} : memref<8x256xf32, #tpu.memory_space<vmem>>, vector<8x256xf32>,
    %15 = arith.addf %9, %12 : vector<8x256xf32>
    %cst_8 = arith.constant 0.000000e+00 : f32
    %16 = vector.broadcast %cst_8 : f32 to vector<8x256xf32>
    %17 = arith.subf %16, %15 : vector<8x256xf32>
    %cst_9 = arith.constant dense<0.000000e+00> : vector<8xf32>
    %18 = vector.multi_reduction <add>, %17, %cst_9 [1] : vector<8x256xf32> to vector<8xf32>
    %19 = vector.shape_cast %18 : vector<8xf32> to vector<8x1xf32>
    %c0_i32 = arith.constant 0 : i32
    %20 = arith.cmpi eq, %arg1, %c0_i32 : i32
    %21 = arith.extui %20 : i1 to i32
    %c0_i32_10 = arith.constant 0 : i32
    %22 = arith.cmpi ne, %21, %c0_i32_10 : i32
    scf.if %22 {
      %cst_15 = arith.constant 0.000000e+00 : f32
      %26 = vector.broadcast %cst_15 : f32 to vector<8x1xf32>
      %c0_16 = arith.constant 0 : index
      %c0_17 = arith.constant 0 : index
      %27 = vector.load %arg5[%c0_16, %c0_17] : memref<8x1xf32, #tpu.memory_space<vmem>>, vector<8x1xf32>
      tpu.vector_store %arg5[%c0_16, %c0_17], %26 {strides = array<i32>} : memref<8x1xf32, #tpu.memory_space<vmem>>, vector<8x1xf32>,
    } else {
    }
    %c0_11 = arith.constant 0 : index
    %c0_12 = arith.constant 0 : index
    %23 = vector.load %arg5[%c0_11, %c0_12] : memref<8x1xf32, #tpu.memory_space<vmem>>, vector<8x1xf32>
    %24 = arith.addf %23, %19 : vector<8x1xf32>
    %c0_13 = arith.constant 0 : index
    %c0_14 = arith.constant 0 : index
    %25 = vector.load %arg5[%c0_13, %c0_14] : memref<8x1xf32, #tpu.memory_space<vmem>>, vector<8x1xf32>
    tpu.vector_store %arg5[%c0_13, %c0_14], %24 {strides = array<i32>} : memref<8x1xf32, #tpu.memory_space<vmem>>, vector<8x1xf32>,
    return
  }
  func.func @transform_0(%arg0: i32, %arg1: i32) -> (i32, i32) {
    %c0_i32 = arith.constant 0 : i32
    return %arg0, %arg1 : i32, i32
  }
  func.func @transform_1(%arg0: i32, %arg1: i32) -> (i32, i32) {
    %c0_i32 = arith.constant 0 : i32
    return %arg0, %arg1 : i32, i32
  }
  func.func @transform_2(%arg0: i32, %arg1: i32) -> (i32, i32) {
    %c0_i32 = arith.constant 0 : i32
    return %arg0, %arg1 : i32, i32
  }
  func.func @transform_3(%arg0: i32, %arg1: i32) -> (i32, i32) {
    %c0_i32 = arith.constant 0 : i32
    %c0_i32_0 = arith.constant 0 : i32
    return %arg0, %c0_i32 : i32, i32
  }
}

</mosaic_0001>

<bundles_post_ra>
// kernel: tpu_custom_call.1
= control target key start
LH: loop header
LB: loop body
LE: loop exit
PB: predicated region body
PF: predicated region fallthrough
CT: control target
= control target key end

     0   :  { %9 = vsyncpa [#allocation3], 0  ;;  %s256_s0 = inlined_call_operand.hbm [shape: f32[8,256], index: 0, kind: input, shape index: {}]   ;;  %s257_s1 = inlined_call_operand.hbm [shape: f32[8,256], index: 1, kind: input, shape index: {}]   ;;  %s258_s2 = inlined_call_operand.hbm [shape: f32[8,256], index: 2, kind: output, shape index: {0}]   ;;  %s259_s3 = inlined_call_operand.vmem [shape: f32[8,1], index: 3, kind: output, shape index: {1}]  }
   0x1   :  { %10 = vsyncpa [#allocation6], 0 }
   0x2   :  { %11 = vsyncpa [#allocation4], 0  ;;  %s185_s12 = smov [#allocation2]   ;;  %s186_s14 = smov [#allocation5]  }
   0x3   :  { %s18_s13 = sshll.u32 %s185_s12, 4  ;;  %s28_s15 = sshll.u32 %s186_s14, 4  ;;  %s19_s13 = int_to_ptr.vmem [resolvable:$true] %s18_s13  ;;  %s29_s15 = int_to_ptr.vmem [resolvable:$true] %s28_s15 }
   0x4   :  { %s113_s18 = scalar_lea.hbm %s256_s0, 256 }
   0x5   :  { %p114_p0 = scmp.ne.s32.totalorder %s256_s0, %s113_s18  ;;  %p117_p1 = scmp.lt.u32.totalorder %s113_s18, %s256_s0 }
   0x7   :  { %p119_p2 = pnand %p117_p1, %p114_p0 }
   0x9   :  { %122 = shalt.err (!%p119_p2)
}
   0xa   :  { %s123_s23 = scalar_lea.vmem %s19_s13, 256  ;;  %p128_p4 = scmp.lt.s32.totalorder %s19_s13, %s19_s13 }
   0xb   :  { %p124_p3 = scmp.ne.s32.totalorder %s19_s13, %s123_s23  ;;  %p129_p5 = scmp.lt.s32.totalorder %s123_s23, %s123_s23 }
   0xd   :  { %p130_p6 = por %p129_p5, %p128_p4 }
   0xf   :  { %p131_p7 = pnand %p130_p6, %p124_p3 }
  0x11   :  { %134 = shalt.err (!%p131_p7)
}
  0x12   :  { %21 = dma.hbm_to_vmem [thread:$0]  %s256_s0, 256, %s19_s13, [#allocation3]  }
  0x13   :  { %s135_s28 = scalar_lea.hbm %s257_s1, 256 }
  0x14   :  { %p136_p8 = scmp.ne.s32.totalorder %s257_s1, %s135_s28  ;;  %p139_p9 = scmp.lt.u32.totalorder %s135_s28, %s257_s1 }
  0x16   :  { %p141_p10 = pnand %p139_p9, %p136_p8 }
  0x18   :  { %144 = shalt.err (!%p141_p10)
}
  0x19   :  { %s145_s6 = scalar_lea.vmem %s29_s15, 256  ;;  %p150_p12 = scmp.lt.s32.totalorder %s29_s15, %s29_s15 }
  0x1a   :  { %p146_p11 = scmp.ne.s32.totalorder %s29_s15, %s145_s6  ;;  %p151_p13 = scmp.lt.s32.totalorder %s145_s6, %s145_s6 }
  0x1c   :  { %p152_p0 = por %p151_p13, %p150_p12 }
  0x1e   :  { %p153_p1 = pnand %p152_p0, %p146_p11 }
  0x20   :  { %156 = shalt.err (!%p153_p1)
}
  0x21   :  { %31 = dma.hbm_to_vmem [thread:$0]  %s257_s1, 256, %s29_s15, [#allocation6]  }
  0x22   :  { %179 = dma.done.wait [#allocation3], 256  }
  0x23   :  { %180 = vsyncadd [#allocation3], 4294967040 }
  0x24   :  { %181 = dma.done.wait [#allocation6], 256  }
  0x25   :  { %182 = vsyncadd [#allocation6], 4294967040  ;;  %v38_v0 = vld [vmem:[#allocation2] sm:$0xff]  ;;  %v39_v1 = vld [vmem:[#allocation2 + $0x8] sm:$0xff]  ;;  %vm75_vm0 = vcmask 7168   ;;  %v187_v27 = vmov 0.0  }
  0x26   :  { %v40_v2 = vld [vmem:[#allocation5] sm:$0xff]  ;;  %v41_v3 = vld [vmem:[#allocation5 + $0x8] sm:$0xff]  ;;  %76 = vst.msk [vmem:[%s259_s3] sm:$0xff] %vm75_vm0, %v187_v27  ;;  %s188_s9 = smov [#allocation7]  }
  0x27   :  { %v42_v4 = vadd.f32 %v40_v2, %v38_v0  ;;  %v43_v5 = vadd.f32 %v41_v3, %v39_v1  ;;  %s87_s10 = sshll.u32 %s188_s9, 4  ;;  %s88_s10 = int_to_ptr.vmem [resolvable:$true] %s87_s10 }
  0x28   :  { %s157_s11 = scalar_lea.vmem %s88_s10, 256  ;;  %p162_p3 = scmp.lt.s32.totalorder %s88_s10, %s88_s10 }
  0x29   :  { %v44_v6 = vmul.f32 0.00390625, %v42_v4  ;;  %v45_v7 = vmul.f32 0.00390625, %v43_v5  ;;  %p158_p2 = scmp.ne.s32.totalorder %s88_s10, %s157_s11  ;;  %p163_p4 = scmp.lt.s32.totalorder %s157_s11, %s157_s11 }
  0x2b   :  { %v46_v8 = vmul.f32 0.99999, %v44_v6  ;;  %v47_v9 = vmul.f32 0.99999, %v45_v7  ;;  %p164_p5 = por %p163_p4, %p162_p3 }
  0x2d   :  { %v48_v10 = vadd.f32 5e-06, %v46_v8  ;;  %v49_v11 = vadd.f32 5e-06, %v47_v9  ;;  %p165_p6 = pnand %p164_p5, %p158_p2 }
  0x2f   :  { %105 = vlog2.f32 %v48_v10  ;;  %v54_v12 = vsub.f32 1.0, %v48_v10  ;;  %v55_v13 = vsub.f32 1.0, %v49_v11 }
  0x30   :  { %107 = vlog2.f32 %v49_v11 }
  0x31   :  { %109 = vlog2.f32 %v54_v12 }
  0x32   :  { %111 = vlog2.f32 %v55_v13 }
  0x39   :  { %v106_v14 = vpop.eup %105 }
  0x3a   :  { %v108_v15 = vpop.eup %107  ;;  %v51_v16 = vmul.f32 0.6931472, %v106_v14 }
  0x3b   :  { %v110_v17 = vpop.eup %109  ;;  %v53_v18 = vmul.f32 0.6931472, %v108_v15 }
  0x3c   :  { %v112_v19 = vpop.eup %111  ;;  %v57_v20 = vmul.f32 0.6931472, %v110_v17 }
  0x3d   :  { %v59_v21 = vmul.f32 0.6931472, %v112_v19 }
  0x3e   :  { %v64_v22 = vadd.f32 %v57_v20, %v51_v16  ;;  %v60_v28 = vsub.f32 %v51_v16, %v57_v20 }
  0x3f   :  { %v65_v23 = vadd.f32 %v59_v21, %v53_v18  ;;  %v61_v29 = vsub.f32 %v53_v18, %v59_v21 }
  0x40   :  { %v66_v24 = vsub.f32 0.0, %v64_v22  ;;  %62 = vst [vmem:[#allocation7] sm:$0xff] %v60_v28 }
  0x41   :  { %v67_v25 = vsub.f32 0.0, %v65_v23  ;;  %63 = vst [vmem:[#allocation7 + $0x8] sm:$0xff] %v61_v29 }
  0x43   :  { %v68_v26 = vadd.f32 %v67_v25, %v66_v24 }
  0x45   :  { %69 = vadd.xlane.f32.xlu0 %v68_v26 }
  0x46   :  { %168 = shalt.err (!%p165_p6)
}
  0x47   :  { %s169_s14 = scalar_lea.hbm %s258_s2, 256 }
  0x48   :  { %p170_p7 = scmp.ne.s32.totalorder %s258_s2, %s169_s14  ;;  %p173_p8 = scmp.lt.u32.totalorder %s169_s14, %s258_s2 }
  0x4a   :  { %p175_p9 = pnand %p173_p8, %p170_p7 }
  0x4c   :  { %178 = shalt.err (!%p175_p9)
}
  0x4d   :  { %90 = dma.vmem_to_hbm [thread:$0]  %s88_s10, 256, %s258_s2, [#allocation4]   ;;  %v77_v30 = vld [vmem:[%s259_s3] sm:$0xff] }
  0xd2   :  { %v70_v31 = vpop.xlane.xlu0 %69 }
  0xd3   :  { %v78_v32 = vadd.f32 %v77_v30, %v70_v31 }
  0xd5   :  { %80 = vst.msk [vmem:[%s259_s3] sm:$0xff] %vm75_vm0, %v78_v32 }
  0xd6   :  { %183 = dma.done.wait [#allocation4], 256  }
  0xd7   :  { %184 = vsyncadd [#allocation4], 4294967040 }
  0xd8   :  { %98 = vsyncpa [#allocation3], 1 }
  0xd9   :  { %99 = vsyncpa [#allocation6], 1 }
  0xda   :  { %100 = vsyncpa [#allocation4], 1 }

</bundles_post_ra>
